<compile_context>
chip_gen: v7x
topology: tpu7x:2x2x1
jax: 0.10.0
libtpu: 0.0.40
codegen_flags: <defaults>
</compile_context>

<pallas_src>
import functools

import jax
import jax.numpy as jnp
from jax.experimental import pallas as pl
from jax.experimental.pallas import tpu as pltpu

_LANE = 128
_SUBLANE = 8
_INV_SQRT2 = 0.7071067811865476
_TANH_C0 = 0.7978845608028654   # sqrt(2/pi)
_TANH_C1 = 0.044715


def _round_up(x, m):
    return (x + m - 1) // m * m


@functools.lru_cache(maxsize=1)
def _vmem_capacity_bytes():
    """Per-core VMEM capacity; conservative 64 MiB fallback (v7x)."""
    try:
        return int(pltpu.get_tpu_info().vmem_capacity_bytes)
    except Exception:
        return 64 * 1024 * 1024


def _gelu_f32(h, approximate):
    if approximate:
        # tanh-approx GELU: the transcendental goes to the EUP slot, which is
        # otherwise idle; erf would sit as a long polynomial on the VALU slot.
        inner = _TANH_C0 * (h + _TANH_C1 * h * h * h)
        return 0.5 * h * (1.0 + jnp.tanh(inner))
    # exact erf formulation == torch.nn.GELU() default
    return 0.5 * h * (1.0 + jax.lax.erf(h * jnp.float32(_INV_SQRT2)))


def _mlp_kernel(x_ref, w1_ref, b1_ref, w2_ref, b2_ref, o_ref, *,
                approximate_gelu):
    """Fused fc1 -> GELU -> fc2 on one tile of tokens.

    Matmuls run in the operands' native dtype on the MXU with f32
    accumulation; bias add and GELU are computed in f32.

    NOTE: the partial last token tile may contain stale VMEM rows which flow
    through the GELU; every output row depends only on its own input row and
    padded rows are masked on writeback, so this is safe — do NOT add any
    cross-row reduction here.
    """
    h = jnp.dot(x_ref[...], w1_ref[...], preferred_element_type=jnp.float32)
    h = h + b1_ref[...]                                    # b1 is f32 (1, H)
    h = _gelu_f32(h, approximate_gelu)
    # cast back to the weight dtype so bf16 weights keep the bf16 MXU path
    y = jnp.dot(h.astype(w2_ref.dtype), w2_ref[...],
                preferred_element_type=jnp.float32)
    y = y + b2_ref[...]                                    # b2 is f32 (1, C_out)
    o_ref[...] = y.astype(o_ref.dtype)


def prepare_mlp_params(w1, b1, w2, b2, *, pad_in_features=True,
                       compute_dtype=None):
    """One-time parameter preparation (keep OUT of the per-step jit path).

    * optionally zero-pads w1's input dim up to a multiple of 128 so the x
      tile / fc1 contraction are lane-dense (x is zero-padded to match per
      call — set pad_in_features=False to avoid the per-call x pad pass)
    * biases are promoted to f32 and reshaped to (1, F) once
    * optional weight cast (e.g. bf16 on v5e, whose MXU peak is bf16-only)
    """
    if compute_dtype is not None:
        w1 = w1.astype(compute_dtype)
        w2 = w2.astype(compute_dtype)
    c_in, hidden = w1.shape
    if pad_in_features and c_in % _LANE:
        w1 = jnp.pad(w1, ((0, _round_up(c_in, _LANE) - c_in), (0, 0)))
    b1_2d = b1.astype(jnp.float32).reshape(1, hidden)
    b2_2d = b2.astype(jnp.float32).reshape(1, w2.shape[1])
    return w1, b1_2d, w2, b2_2d


def _choose_tile_m(tile_m, tokens, c_in_p, hidden, c_out, x_bytes, w_bytes,
                   out_bytes, weight_bufs, budget_bytes):
    """Largest token tile <= tile_m (multiple of 8) fitting the VMEM budget.

    For very large widths (C >= ~1024, H = 4C) a better structural fix than
    shrinking tm is a hidden-dim grid axis ('arbitrary') with an f32
    accumulator scratch — not needed for Swin-sized widths.
    """
    tm = min(_round_up(tile_m, _SUBLANE), _round_up(tokens, _SUBLANE))
    tm = max(_SUBLANE, tm)
    # grid-invariant weights + f32 biases stay resident (x weight_bufs buffers)
    fixed = weight_bufs * ((c_in_p * hidden + hidden * c_out) * w_bytes
                           + (hidden + c_out) * 4)

    def per_tile(t):
        return (2 * t * c_in_p * x_bytes        # x tile, double-buffered
                + 2 * t * c_out * out_bytes     # out tile, double-buffered
                + t * hidden * 4                # f32 fc1/GELU intermediate
                + t * hidden * w_bytes          # cast of h for the fc2 pass
                + t * c_out * 4)                # f32 fc2 result

    while tm > _SUBLANE and fixed + per_tile(tm) > budget_bytes:
        tm = max(_SUBLANE, tm - (64 if tm > 64 else _SUBLANE))
    return tm, fixed + per_tile(tm)


@functools.partial(jax.jit,
                   static_argnames=("tile_m", "approximate_gelu",
                                    "single_buffer_weights"))
def mlp_pallas(x, w1, b1_2d, w2, b2_2d, *, tile_m=512, approximate_gelu=True,
               single_buffer_weights=True):
    """x: (B, N, C_in) -> (B, N, C_out).  Params from prepare_mlp_params.

    Dropout p=0.0 -> identity (matches the reference module's default).
    """
    B, N, C_in = x.shape
    C_in_p, H = w1.shape
    C_out = w2.shape[1]

    tokens = B * N
    x2 = x.reshape(tokens, C_in)
    if C_in_p != C_in:
        # lane-dense x tiles + full-K fc1 contraction (w1 was pre-padded once)
        x2 = jnp.pad(x2, ((0, 0), (0, C_in_p - C_in)))

    x_bytes = x.dtype.itemsize
    w_bytes = w1.dtype.itemsize
    out_bytes = x.dtype.itemsize
    weight_bufs = 1 if single_buffer_weights else 2

    # Generation-aware VMEM budget: 128 MiB on v5e/v6e, 64 MiB/core on v7x.
    capacity = _vmem_capacity_bytes()
    vmem_cap = int(0.85 * capacity)
    budget = int(vmem_cap / 1.25)

    tm, est_vmem = _choose_tile_m(tile_m, tokens, C_in_p, H, C_out,
                                  x_bytes, w_bytes, out_bytes,
                                  weight_bufs, budget)

    # Prefer an even number of grid steps so the "parallel" token axis splits
    # evenly across v7x's two TensorCores (one extra cheap step elsewhere).
    steps = pl.cdiv(tokens, tm)
    if steps > 1 and steps % 2 == 1:
        tm_even = max(_SUBLANE, _round_up(pl.cdiv(tokens, steps + 1), _SUBLANE))
        if pl.cdiv(tokens, tm_even) % 2 == 0:
            tm = tm_even
    grid = (pl.cdiv(tokens, tm),)

    vmem_limit = int(min(max(est_vmem * 1.25, 32 * 1024 * 1024), vmem_cap))

    flops = 2 * tokens * (C_in_p * H + H * C_out)
    bytes_accessed = (tokens * (C_in_p + C_out) * x_bytes
                      + (C_in_p * H + H * C_out) * w_bytes
                      + (H + C_out) * 4)
    cost = pl.CostEstimate(flops=flops, transcendentals=tokens * H,
                           bytes_accessed=bytes_accessed)

    if single_buffer_weights:
        # Weights / biases never change across the grid -> single buffer.
        resident = functools.partial(pl.BlockSpec, pipeline_mode=pl.Buffered(1))
    else:
        resident = pl.BlockSpec

    kernel = functools.partial(_mlp_kernel, approximate_gelu=approximate_gelu)

    out = pl.pallas_call(
        kernel,
        out_shape=jax.ShapeDtypeStruct((tokens, C_out), x.dtype),
        grid_spec=pltpu.PrefetchScalarGridSpec(
            num_scalar_prefetch=0,
            grid=grid,
            in_specs=[
                pl.BlockSpec((tm, C_in_p), lambda i: (i, 0)),   # x tile
                resident((C_in_p, H), lambda i: (0, 0)),        # w1 (resident)
                resident((1, H), lambda i: (0, 0)),             # b1 (f32)
                resident((H, C_out), lambda i: (0, 0)),         # w2 (resident)
                resident((1, C_out), lambda i: (0, 0)),         # b2 (f32)
            ],
            # Output emitted at the natural C_out: no padded columns, no
            # post-kernel slice / extra HBM pass (block last dim == full array
            # dim is always legal; when C_out % 128 == 0 it is also lane-dense).
            out_specs=pl.BlockSpec((tm, C_out), lambda i: (i, 0)),
        ),
        compiler_params=pltpu.CompilerParams(
            dimension_semantics=("parallel",),
            vmem_limit_bytes=vmem_limit,
        ),
        cost_estimate=cost,
    )(x2, w1, b1_2d, w2, b2_2d)

    return out.reshape(B, N, C_out)


def init_mlp_params(key, in_features, hidden_features, out_features,
                    dtype=jnp.float32):
    """Deterministic init mimicking nn.Linear default (uniform +-1/sqrt(fan_in))."""
    k1, k2, k3, k4 = jax.random.split(key, 4)
    lim1 = 1.0 / jnp.sqrt(in_features)
    lim2 = 1.0 / jnp.sqrt(hidden_features)
    # stored as (in, out) — transposed relative to torch's (out, in)
    w1 = jax.random.uniform(k1, (in_features, hidden_features), dtype, -lim1, lim1)
    b1 = jax.random.uniform(k2, (hidden_features,), dtype, -lim1, lim1)
    w2 = jax.random.uniform(k3, (hidden_features, out_features), dtype, -lim2, lim2)
    b2 = jax.random.uniform(k4, (out_features,), dtype, -lim2, lim2)
    return w1, b1, w2, b2


if __name__ == "__main__":
    key = jax.random.PRNGKey(0)
    kx, kp = jax.random.split(key)

    # Small Swin-like shapes: batch=2, one 8x8 window (64 tokens), C=32,
    # mlp_ratio=4 -> hidden=128, C_out=C_in.
    B, N, C_in = 2, 64, 32
    hidden, C_out = 4 * C_in, C_in

    x = jax.random.normal(kx, (B, N, C_in), dtype=jnp.float32)
    w1, b1, w2, b2 = init_mlp_params(kp, C_in, hidden, C_out)
    params = prepare_mlp_params(w1, b1, w2, b2)   # one-time pad / f32 biases

    def run(**kw):
        try:
            return jax.block_until_ready(mlp_pallas(x, *params, **kw))
        except Exception:
            # Fallback: identical math, default (double) buffering for weights.
            return jax.block_until_ready(
                mlp_pallas(x, *params, single_buffer_weights=False, **kw))

    # Plain-JAX references (same math as the PyTorch module; drop=0.0).
    hp = jax.lax.Precision.HIGHEST
    x2d = x.reshape(-1, C_in)
    h = jnp.dot(x2d, w1, precision=hp) + b1
    h_tanh = 0.5 * h * (1.0 + jnp.tanh(_TANH_C0 * (h + _TANH_C1 * h ** 3)))
    h_erf = 0.5 * h * (1.0 + jax.lax.erf(h * _INV_SQRT2))
    y_ref_tanh = (jnp.dot(h_tanh, w2, precision=hp) + b2).reshape(B, N, C_out)
    y_ref_erf = (jnp.dot(h_erf, w2, precision=hp) + b2).reshape(B, N, C_out)

    # Tolerances account for MXU pass precision on f32 operands.
    y_fast = run()                                  # tanh-GELU (EUP path)
    assert y_fast.shape == (B, N, C_out)
    assert jnp.allclose(y_fast, y_ref_tanh, atol=2e-2, rtol=2e-2)
    assert jnp.allclose(y_fast, y_ref_erf, atol=5e-2, rtol=5e-2)

    y_exact = run(approximate_gelu=False)           # exact erf == nn.GELU()
    assert jnp.allclose(y_exact, y_ref_erf, atol=2e-2, rtol=2e-2)

    # TODO(synk): nn.Dropout with p>0.0 (training mode) is not implemented;
    # the reference module defaults to drop=0.0 which is the identity.
    print("KERNEL_OK")
</pallas_src>

<mosaic_0001>
module attributes {stable_mosaic.version = 11 : i64} {
  func.func @_mlp_kernel(%arg0: i32, %arg1: memref<128x128xf32, #tpu.memory_space<vmem>>, %arg2: memref<128x128xf32, #tpu.memory_space<vmem>>, %arg3: memref<1x128xf32, #tpu.memory_space<vmem>>, %arg4: memref<128x32xf32, #tpu.memory_space<vmem>>, %arg5: memref<1x32xf32, #tpu.memory_space<vmem>>, %arg6: memref<128x32xf32, #tpu.memory_space<vmem>>) attributes {dimension_semantics = [#tpu.dimension_semantics<parallel>], iteration_bounds = array<i64: 1>, scalar_prefetch = 0 : i64, scratch_operands = 0 : i64, tpu.core_type = #tpu.core_type<tc>, window_params = [{transform_indices = @transform_0, window_bounds = array<i64: 128, 128>}, {pipeline_mode = #tpu.pipeline_mode<synchronous>, transform_indices = @transform_1, window_bounds = array<i64: 128, 128>}, {pipeline_mode = #tpu.pipeline_mode<synchronous>, transform_indices = @transform_2, window_bounds = array<i64: 1, 128>}, {pipeline_mode = #tpu.pipeline_mode<synchronous>, transform_indices = @transform_3, window_bounds = array<i64: 128, 32>}, {pipeline_mode = #tpu.pipeline_mode<synchronous>, transform_indices = @transform_4, window_bounds = array<i64: 1, 32>}, {transform_indices = @transform_5, window_bounds = array<i64: 128, 32>}]} {
    %c0 = arith.constant 0 : index
    %c0_0 = arith.constant 0 : index
    %0 = vector.load %arg1[%c0, %c0_0] : memref<128x128xf32, #tpu.memory_space<vmem>>, vector<128x128xf32>
    %c0_1 = arith.constant 0 : index
    %c0_2 = arith.constant 0 : index
    %1 = vector.load %arg2[%c0_1, %c0_2] : memref<128x128xf32, #tpu.memory_space<vmem>>, vector<128x128xf32>
    %cst = arith.constant dense<0.000000e+00> : vector<128x128xf32>
    %2 = tpu.matmul %0, %1, %cst {dimension_numbers = #tpu.dot_dimension_numbers<[1], [0], [0], [1], [0, 0, 1, 1], [], []>} : vector<128x128xf32>, vector<128x128xf32>, vector<128x128xf32> -> vector<128x128xf32>
    %c0_3 = arith.constant 0 : index
    %c0_4 = arith.constant 0 : index
    %3 = vector.load %arg3[%c0_3, %c0_4] : memref<1x128xf32, #tpu.memory_space<vmem>>, vector<1x128xf32>
    %4 = vector.broadcast %3 : vector<1x128xf32> to vector<128x128xf32>
    %5 = arith.addf %2, %4 : vector<128x128xf32>
    %cst_5 = arith.constant 4.471500e-02 : f32
    %6 = vector.broadcast %cst_5 : f32 to vector<128x128xf32>
    %7 = arith.mulf %6, %5 : vector<128x128xf32>
    %8 = arith.mulf %7, %5 : vector<128x128xf32>
    %9 = arith.mulf %8, %5 : vector<128x128xf32>
    %10 = arith.addf %5, %9 : vector<128x128xf32>
    %cst_6 = arith.constant 0.797884583 : f32
    %11 = vector.broadcast %cst_6 : f32 to vector<128x128xf32>
    %12 = arith.mulf %11, %10 : vector<128x128xf32>
    %cst_7 = arith.constant 5.000000e-01 : f32
    %13 = vector.broadcast %cst_7 : f32 to vector<128x128xf32>
    %14 = arith.mulf %13, %5 : vector<128x128xf32>
    %15 = math.tanh %12 : vector<128x128xf32>
    %cst_8 = arith.constant 1.000000e+00 : f32
    %16 = vector.broadcast %cst_8 : f32 to vector<128x128xf32>
    %17 = arith.addf %16, %15 : vector<128x128xf32>
    %18 = arith.mulf %14, %17 : vector<128x128xf32>
    %c0_9 = arith.constant 0 : index
    %c0_10 = arith.constant 0 : index
    %19 = vector.load %arg4[%c0_9, %c0_10] : memref<128x32xf32, #tpu.memory_space<vmem>>, vector<128x32xf32>
    %cst_11 = arith.constant dense<0.000000e+00> : vector<128x32xf32>
    %20 = tpu.matmul %18, %19, %cst_11 {dimension_numbers = #tpu.dot_dimension_numbers<[1], [0], [0], [1], [0, 0, 1, 1], [], []>} : vector<128x128xf32>, vector<128x32xf32>, vector<128x32xf32> -> vector<128x32xf32>
    %c0_12 = arith.constant 0 : index
    %c0_13 = arith.constant 0 : index
    %21 = vector.load %arg5[%c0_12, %c0_13] : memref<1x32xf32, #tpu.memory_space<vmem>>, vector<1x32xf32>
    %22 = vector.broadcast %21 : vector<1x32xf32> to vector<128x32xf32>
    %23 = arith.addf %20, %22 : vector<128x32xf32>
    %c0_14 = arith.constant 0 : index
    %c0_15 = arith.constant 0 : index
    %24 = vector.load %arg6[%c0_14, %c0_15] : memref<128x32xf32, #tpu.memory_space<vmem>>, vector<128x32xf32>
    tpu.vector_store %arg6[%c0_14, %c0_15], %23 {strides = array<i32>} : memref<128x32xf32, #tpu.memory_space<vmem>>, vector<128x32xf32>,
    return
  }
  func.func @transform_0(%arg0: i32) -> (i32, i32) {
    %c0_i32 = arith.constant 0 : i32
    %c0_i32_0 = arith.constant 0 : i32
    return %arg0, %c0_i32 : i32, i32
  }
  func.func @transform_1(%arg0: i32) -> (i32, i32) {
    %c0_i32 = arith.constant 0 : i32
    %c0_i32_0 = arith.constant 0 : i32
    %c0_i32_1 = arith.constant 0 : i32
    return %c0_i32, %c0_i32_0 : i32, i32
  }
  func.func @transform_2(%arg0: i32) -> (i32, i32) {
    %c0_i32 = arith.constant 0 : i32
    %c0_i32_0 = arith.constant 0 : i32
    %c0_i32_1 = arith.constant 0 : i32
    return %c0_i32, %c0_i32_0 : i32, i32
  }
  func.func @transform_3(%arg0: i32) -> (i32, i32) {
    %c0_i32 = arith.constant 0 : i32
    %c0_i32_0 = arith.constant 0 : i32
    %c0_i32_1 = arith.constant 0 : i32
    return %c0_i32, %c0_i32_0 : i32, i32
  }
  func.func @transform_4(%arg0: i32) -> (i32, i32) {
    %c0_i32 = arith.constant 0 : i32
    %c0_i32_0 = arith.constant 0 : i32
    %c0_i32_1 = arith.constant 0 : i32
    return %c0_i32, %c0_i32_0 : i32, i32
  }
  func.func @transform_5(%arg0: i32) -> (i32, i32) {
    %c0_i32 = arith.constant 0 : i32
    %c0_i32_0 = arith.constant 0 : i32
    return %arg0, %c0_i32 : i32, i32
  }
}

module attributes {stable_mosaic.version = 11 : i64} {
  func.func @_mlp_kernel(%arg0: i32, %arg1: memref<128x128xf32, #tpu.memory_space<vmem>>, %arg2: memref<128x128xf32, #tpu.memory_space<vmem>>, %arg3: memref<1x128xf32, #tpu.memory_space<vmem>>, %arg4: memref<128x32xf32, #tpu.memory_space<vmem>>, %arg5: memref<1x32xf32, #tpu.memory_space<vmem>>, %arg6: memref<128x32xf32, #tpu.memory_space<vmem>>) attributes {dimension_semantics = [#tpu.dimension_semantics<parallel>], iteration_bounds = array<i64: 1>, scalar_prefetch = 0 : i64, scratch_operands = 0 : i64, tpu.core_type = #tpu.core_type<tc>, window_params = [{transform_indices = @transform_0, window_bounds = array<i64: 128, 128>}, {pipeline_mode = #tpu.pipeline_mode<synchronous>, transform_indices = @transform_1, window_bounds = array<i64: 128, 128>}, {pipeline_mode = #tpu.pipeline_mode<synchronous>, transform_indices = @transform_2, window_bounds = array<i64: 1, 128>}, {pipeline_mode = #tpu.pipeline_mode<synchronous>, transform_indices = @transform_3, window_bounds = array<i64: 128, 32>}, {pipeline_mode = #tpu.pipeline_mode<synchronous>, transform_indices = @transform_4, window_bounds = array<i64: 1, 32>}, {transform_indices = @transform_5, window_bounds = array<i64: 128, 32>}]} {
    %c0 = arith.constant 0 : index
    %c0_0 = arith.constant 0 : index
    %0 = vector.load %arg1[%c0, %c0_0] : memref<128x128xf32, #tpu.memory_space<vmem>>, vector<128x128xf32>
    %c0_1 = arith.constant 0 : index
    %c0_2 = arith.constant 0 : index
    %1 = vector.load %arg2[%c0_1, %c0_2] : memref<128x128xf32, #tpu.memory_space<vmem>>, vector<128x128xf32>
    %cst = arith.constant dense<0.000000e+00> : vector<128x128xf32>
    %2 = tpu.matmul %0, %1, %cst {dimension_numbers = #tpu.dot_dimension_numbers<[1], [0], [0], [1], [0, 0, 1, 1], [], []>} : vector<128x128xf32>, vector<128x128xf32>, vector<128x128xf32> -> vector<128x128xf32>
    %c0_3 = arith.constant 0 : index
    %c0_4 = arith.constant 0 : index
    %3 = vector.load %arg3[%c0_3, %c0_4] : memref<1x128xf32, #tpu.memory_space<vmem>>, vector<1x128xf32>
    %4 = vector.broadcast %3 : vector<1x128xf32> to vector<128x128xf32>
    %5 = arith.addf %2, %4 : vector<128x128xf32>
    %cst_5 = arith.constant 4.471500e-02 : f32
    %6 = vector.broadcast %cst_5 : f32 to vector<128x128xf32>
    %7 = arith.mulf %6, %5 : vector<128x128xf32>
    %8 = arith.mulf %7, %5 : vector<128x128xf32>
    %9 = arith.mulf %8, %5 : vector<128x128xf32>
    %10 = arith.addf %5, %9 : vector<128x128xf32>
    %cst_6 = arith.constant 0.797884583 : f32
    %11 = vector.broadcast %cst_6 : f32 to vector<128x128xf32>
    %12 = arith.mulf %11, %10 : vector<128x128xf32>
    %cst_7 = arith.constant 5.000000e-01 : f32
    %13 = vector.broadcast %cst_7 : f32 to vector<128x128xf32>
    %14 = arith.mulf %13, %5 : vector<128x128xf32>
    %15 = math.tanh %12 : vector<128x128xf32>
    %cst_8 = arith.constant 1.000000e+00 : f32
    %16 = vector.broadcast %cst_8 : f32 to vector<128x128xf32>
    %17 = arith.addf %16, %15 : vector<128x128xf32>
    %18 = arith.mulf %14, %17 : vector<128x128xf32>
    %c0_9 = arith.constant 0 : index
    %c0_10 = arith.constant 0 : index
    %19 = vector.load %arg4[%c0_9, %c0_10] : memref<128x32xf32, #tpu.memory_space<vmem>>, vector<128x32xf32>
    %cst_11 = arith.constant dense<0.000000e+00> : vector<128x32xf32>
    %20 = tpu.matmul %18, %19, %cst_11 {dimension_numbers = #tpu.dot_dimension_numbers<[1], [0], [0], [1], [0, 0, 1, 1], [], []>} : vector<128x128xf32>, vector<128x32xf32>, vector<128x32xf32> -> vector<128x32xf32>
    %c0_12 = arith.constant 0 : index
    %c0_13 = arith.constant 0 : index
    %21 = vector.load %arg5[%c0_12, %c0_13] : memref<1x32xf32, #tpu.memory_space<vmem>>, vector<1x32xf32>
    %22 = vector.broadcast %21 : vector<1x32xf32> to vector<128x32xf32>
    %23 = arith.addf %20, %22 : vector<128x32xf32>
    %c0_14 = arith.constant 0 : index
    %c0_15 = arith.constant 0 : index
    %24 = vector.load %arg6[%c0_14, %c0_15] : memref<128x32xf32, #tpu.memory_space<vmem>>, vector<128x32xf32>
    tpu.vector_store %arg6[%c0_14, %c0_15], %23 {strides = array<i32>} : memref<128x32xf32, #tpu.memory_space<vmem>>, vector<128x32xf32>,
    return
  }
  func.func @transform_0(%arg0: i32) -> (i32, i32) {
    %c0_i32 = arith.constant 0 : i32
    %c0_i32_0 = arith.constant 0 : i32
    return %arg0, %c0_i32 : i32, i32
  }
  func.func @transform_1(%arg0: i32) -> (i32, i32) {
    %c0_i32 = arith.constant 0 : i32
    %c0_i32_0 = arith.constant 0 : i32
    %c0_i32_1 = arith.constant 0 : i32
    return %c0_i32, %c0_i32_0 : i32, i32
  }
  func.func @transform_2(%arg0: i32) -> (i32, i32) {
    %c0_i32 = arith.constant 0 : i32
    %c0_i32_0 = arith.constant 0 : i32
    %c0_i32_1 = arith.constant 0 : i32
    return %c0_i32, %c0_i32_0 : i32, i32
  }
  func.func @transform_3(%arg0: i32) -> (i32, i32) {
    %c0_i32 = arith.constant 0 : i32
    %c0_i32_0 = arith.constant 0 : i32
    %c0_i32_1 = arith.constant 0 : i32
    return %c0_i32, %c0_i32_0 : i32, i32
  }
  func.func @transform_4(%arg0: i32) -> (i32, i32) {
    %c0_i32 = arith.constant 0 : i32
    %c0_i32_0 = arith.constant 0 : i32
    %c0_i32_1 = arith.constant 0 : i32
    return %c0_i32, %c0_i32_0 : i32, i32
  }
  func.func @transform_5(%arg0: i32) -> (i32, i32) {
    %c0_i32 = arith.constant 0 : i32
    %c0_i32_0 = arith.constant 0 : i32
    return %arg0, %c0_i32 : i32, i32
  }
}

</mosaic_0001>

<bundles_post_ra>
// kernel: mlp_pallas.1
= control target key start
LH: loop header
LB: loop body
LE: loop exit
PB: predicated region body
PF: predicated region fallthrough
CT: control target
= control target key end

     0   :  { %vm516_vm0 = vcmask 261120   ;;  %s1171_s1 = inlined_call_operand.vmem [shape: f32[128,128], index: 1, kind: input, shape index: {}]   ;;  %s1172_s0 = inlined_call_operand.vmem [shape: f32[128,128], index: 0, kind: input, shape index: {}]   ;;  %s1173_s3 = inlined_call_operand.vmem [shape: f32[128,32], index: 3, kind: input, shape index: {}]   ;;  %s1174_s2 = inlined_call_operand.vmem [shape: f32[1,128], index: 2, kind: input, shape index: {}]   ;;  %s1175_s4 = inlined_call_operand.vmem [shape: f32[1,32], index: 4, kind: input, shape index: {}]   ;;  %s1176_s5 = inlined_call_operand.vmem [shape: f32[128,32], index: 5, kind: output, shape index: {}]  }
   0x1   :  { %v36_v0 = vld [vmem:[%s1171_s1] sm:$0xff]  ;;  %v37_v1 = vld [vmem:[%s1171_s1 + $0x8] sm:$0xff]  ;;  %v38_v2 = vld [vmem:[%s1171_s1 + $0x10] sm:$0xff] }
   0x2   :  { %v715_v3 = vpack.c.bf16 %v37_v1, %v36_v0  ;;  %v39_v4 = vld [vmem:[%s1171_s1 + $0x18] sm:$0xff]  ;;  %v40_v6 = vld [vmem:[%s1171_s1 + $0x20] sm:$0xff]  ;;  %v41_v7 = vld [vmem:[%s1171_s1 + $0x28] sm:$0xff] }
   0x3   :  { %v719_v5 = vpack.c.bf16 %v39_v4, %v38_v2  ;;  %v723_v8 = vpack.c.bf16 %v41_v7, %v40_v6  ;;  %v20_v9 = vld [vmem:[%s1172_s0] sm:$0xff]  ;;  %v42_v10 = vld [vmem:[%s1171_s1 + $0x30] sm:$0xff]  ;;  %v43_v11 = vld [vmem:[%s1171_s1 + $0x38] sm:$0xff] }
   0x4   :  { %716 = vmatprep.subr.bf16.mxu0 %v715_v3  ;;  %635 = vmatprep.mubr.f32.mxu0 %v20_v9  ;;  %v727_v12 = vpack.c.bf16 %v43_v11, %v42_v10  ;;  %v44_v13 = vld [vmem:[%s1171_s1 + $0x40] sm:$0xff]  ;;  %v45_v14 = vld [vmem:[%s1171_s1 + $0x48] sm:$0xff]  ;;  %v46_v19 = vld [vmem:[%s1171_s1 + $0x50] sm:$0xff] }
   0x5   :  { %718 = vmatpush3.bf16.msra.mxu0 %v715_v3  ;;  %v348_v15 = vld [vmem:[%s1173_s3] sm:$0xff]  ;;  %v349_v16 = vld [vmem:[%s1173_s3 + $0x8] sm:$0xff]  ;;  %v731_v18 = vpack.c.bf16 %v45_v14, %v44_v13  ;;  %v47_v20 = vld [vmem:[%s1171_s1 + $0x58] sm:$0xff] }
   0x6   :  { %720 = vmatprep.subr.bf16.mxu0 %v719_v5  ;;  %v747_v17 = vpack.c.bf16 %v349_v16, %v348_v15  ;;  %v735_v21 = vpack.c.bf16 %v47_v20, %v46_v19  ;;  %v48_v22 = vld [vmem:[%s1171_s1 + $0x60] sm:$0xff]  ;;  %v49_v23 = vld [vmem:[%s1171_s1 + $0x68] sm:$0xff]  ;;  %v50_v25 = vld [vmem:[%s1171_s1 + $0x70] sm:$0xff] }
   0x7   :  { %v739_v24 = vpack.c.bf16 %v49_v23, %v48_v22  ;;  %v51_v26 = vld [vmem:[%s1171_s1 + $0x78] sm:$0xff]  ;;  %v21_v28 = vld [vmem:[%s1172_s0 + $0x8] sm:$0xff]  ;;  %v22_v29 = vld [vmem:[%s1172_s0 + $0x10] sm:$0xff] }
   0x8   :  { %748 = vmatprep.subr.bf16.mxu1 %v747_v17  ;;  %v743_v27 = vpack.c.bf16 %v51_v26, %v50_v25  ;;  %v23_v30 = vld [vmem:[%s1172_s0 + $0x18] sm:$0xff]  ;;  %v24_v31 = vld [vmem:[%s1172_s0 + $0x20] sm:$0xff]  ;;  %v25_v32 = vld [vmem:[%s1172_s0 + $0x28] sm:$0xff] }
   0x9   :  { %722 = vmatpush3.bf16.msra.mxu0 %v719_v5  ;;  %750 = vmatpush3.bf16.msra.mxu1 %v747_v17  ;;  %v26_v33 = vld [vmem:[%s1172_s0 + $0x30] sm:$0xff]  ;;  %v27_v34 = vld [vmem:[%s1172_s0 + $0x38] sm:$0xff]  ;;  %v28_v35 = vld [vmem:[%s1172_s0 + $0x40] sm:$0xff] }
   0xa   :  { %724 = vmatprep.subr.bf16.mxu0 %v723_v8  ;;  %v29_v36 = vld [vmem:[%s1172_s0 + $0x48] sm:$0xff]  ;;  %v30_v37 = vld [vmem:[%s1172_s0 + $0x50] sm:$0xff]  ;;  %v31_v38 = vld [vmem:[%s1172_s0 + $0x58] sm:$0xff] }
   0xb   :  { %v32_v39 = vld [vmem:[%s1172_s0 + $0x60] sm:$0xff]  ;;  %v33_v40 = vld [vmem:[%s1172_s0 + $0x68] sm:$0xff]  ;;  %v34_v41 = vld [vmem:[%s1172_s0 + $0x70] sm:$0xff] }
   0xc   :  { %v35_v42 = vld [vmem:[%s1172_s0 + $0x78] sm:$0xff]  ;;  %v350_v43 = vld [vmem:[%s1173_s3 + $0x10] sm:$0xff]  ;;  %v352_v46 = vld [vmem:[%s1173_s3 + $0x20] sm:$0xff] }
   0xd   :  { %726 = vmatpush3.bf16.msra.mxu0 %v723_v8  ;;  %v351_v44 = vld [vmem:[%s1173_s3 + $0x18] sm:$0xff]  ;;  %v353_v47 = vld [vmem:[%s1173_s3 + $0x28] sm:$0xff]  ;;  %v354_v49 = vld [vmem:[%s1173_s3 + $0x30] sm:$0xff] }
   0xe   :  { %728 = vmatprep.subr.bf16.mxu0 %v727_v12  ;;  %v751_v45 = vpack.c.bf16 %v351_v44, %v350_v43  ;;  %v755_v48 = vpack.c.bf16 %v353_v47, %v352_v46  ;;  %v355_v50 = vld [vmem:[%s1173_s3 + $0x38] sm:$0xff]  ;;  %v356_v52 = vld [vmem:[%s1173_s3 + $0x40] sm:$0xff]  ;;  %v357_v53 = vld [vmem:[%s1173_s3 + $0x48] sm:$0xff] }
   0xf   :  { %v759_v51 = vpack.c.bf16 %v355_v50, %v354_v49  ;;  %v763_v54 = vpack.c.bf16 %v357_v53, %v356_v52  ;;  %v358_v55 = vld [vmem:[%s1173_s3 + $0x50] sm:$0xff]  ;;  %v359_v56 = vld [vmem:[%s1173_s3 + $0x58] sm:$0xff]  ;;  %v360_v58 = vld [vmem:[%s1173_s3 + $0x60] sm:$0xff] }
  0x10   :  { %752 = vmatprep.subr.bf16.mxu1 %v751_v45  ;;  %v767_v57 = vpack.c.bf16 %v359_v56, %v358_v55  ;;  %v361_v59 = vld [vmem:[%s1173_s3 + $0x68] sm:$0xff]  ;;  %v362_v61 = vld [vmem:[%s1173_s3 + $0x70] sm:$0xff]  ;;  %v363_v62 = vld [vmem:[%s1173_s3 + $0x78] sm:$0xff] }
  0x11   :  { %730 = vmatpush3.bf16.msra.mxu0 %v727_v12  ;;  %754 = vmatpush3.bf16.msra.mxu1 %v751_v45  ;;  %v771_v60 = vpack.c.bf16 %v361_v59, %v360_v58  ;;  %v775_v63 = vpack.c.bf16 %v363_v62, %v362_v61  ;;  %v988_v0 = vld [vmem:[%s1174_s2] ss:$0 sm:$0xff] }
  0x12   :  { %732 = vmatprep.subr.bf16.mxu0 %v731_v18  ;;  %756 = vmatprep.subr.bf16.mxu1 %v755_v48 }
  0x15   :  { %734 = vmatpush3.bf16.msra.mxu0 %v731_v18  ;;  %758 = vmatpush3.bf16.msra.mxu1 %v755_v48 }
  0x16   :  { %736 = vmatprep.subr.bf16.mxu0 %v735_v21  ;;  %760 = vmatprep.subr.bf16.mxu1 %v759_v51 }
  0x19   :  { %738 = vmatpush3.bf16.msra.mxu0 %v735_v21  ;;  %762 = vmatpush3.bf16.msra.mxu1 %v759_v51 }
  0x1a   :  { %740 = vmatprep.subr.bf16.mxu0 %v739_v24  ;;  %764 = vmatprep.subr.bf16.mxu1 %v763_v54 }
  0x1d   :  { %742 = vmatpush3.bf16.msra.mxu0 %v739_v24  ;;  %766 = vmatpush3.bf16.msra.mxu1 %v763_v54 }
  0x1e   :  { %744 = vmatprep.subr.bf16.mxu0 %v743_v27  ;;  %768 = vmatprep.subr.bf16.mxu1 %v767_v57 }
  0x21   :  { %746 = vmatpush3.bf16.msra.mxu0 %v743_v27  ;;  %770 = vmatpush3.bf16.msra.mxu1 %v767_v57 }
  0x22   :  { %772 = vmatprep.subr.bf16.mxu1 %v771_v60 }
  0x24   :  { %636 = vmatmul.mubr.f32.vlgmr.msra.gmra.mrb[0].mxu0 %v21_v28 }
  0x25   :  { %638 = vmatprep.mubr.f32.mxu0 %v22_v29  ;;  %774 = vmatpush3.bf16.msra.mxu1 %v771_v60 }
  0x26   :  { %776 = vmatprep.subr.bf16.mxu1 %v775_v63 }
  0x28   :  { %639 = vmatmul.mubr.f32.gmra.mrb[2].mxu0 %v23_v30 }
  0x29   :  { %641 = vmatprep.mubr.f32.mxu0 %v24_v31  ;;  %778 = vmatpush3.bf16.msra.mxu1 %v775_v63 }
  0x2c   :  { %642 = vmatmul.mubr.f32.gmra.mrb[4].mxu0 %v25_v32 }
  0x2d   :  { %644 = vmatprep.mubr.f32.mxu0 %v26_v33 }
  0x30   :  { %645 = vmatmul.mubr.f32.gmra.mrb[6].mxu0 %v27_v34 }
  0x31   :  { %647 = vmatprep.mubr.f32.mxu0 %v28_v35 }
  0x34   :  { %648 = vmatmul.mubr.f32.gmra.mrb[8].mxu0 %v29_v36 }
  0x35   :  { %650 = vmatprep.mubr.f32.mxu0 %v30_v37 }
  0x38   :  { %651 = vmatmul.mubr.f32.gmra.mrb[10].mxu0 %v31_v38 }
  0x39   :  { %653 = vmatprep.mubr.f32.mxu0 %v32_v39 }
  0x3c   :  { %654 = vmatmul.mubr.f32.gmra.mrb[12].mxu0 %v33_v40 }
  0x3d   :  { %656 = vmatprep.mubr.f32.mxu0 %v34_v41 }
  0x40   :  { %657 = vmatmul.mubr.f32.gmra.mrb[14].mxu0 %v35_v42 }
  0xf7   :  { %v637_v1 = vpop.f32.mrb[0].mxu0 }
  0xf8   :  { %v131_v2 = vadd.f32 %v637_v1, %v988_v0  ;;  %v125_v3 = vpop.f32.mrb[1].mxu0 }
  0xf9   :  { %v126_v4 = vadd.f32 %v988_v0, %v125_v3 }
  0xfa   :  { %v205_v5 = vmul.f32 0.044715, %v131_v2  ;;  %v285_v54 = vmul.f32 0.5, %v131_v2 }
  0xfb   :  { %v640_v6 = vpop.f32.mrb[2].mxu0  ;;  %v204_v7 = vmul.f32 0.044715, %v126_v4  ;;  %v284_v59 = vmul.f32 0.5, %v126_v4 }
  0xfc   :  { %v221_v8 = vmul.f32 %v205_v5, %v131_v2  ;;  %v993_v9 = vadd.f32 %v640_v6, %v988_v0  ;;  %v135_v10 = vpop.f32.mrb[3].mxu0 }
  0xfd   :  { %v996_v11 = vadd.f32 %v988_v0, %v135_v10  ;;  %v220_v12 = vmul.f32 %v204_v7, %v126_v4 }
  0xfe   :  { %v207_v13 = vmul.f32 0.044715, %v993_v9  ;;  %v237_v14 = vmul.f32 %v221_v8, %v131_v2  ;;  %v287_v8 = vmul.f32 0.5, %v993_v9 }
  0xff   :  { %v206_v15 = vmul.f32 0.044715, %v996_v11  ;;  %v643_v16 = vpop.f32.mrb[4].mxu0  ;;  %v236_v17 = vmul.f32 %v220_v12, %v126_v4 }
 0x100   :  { %v223_v18 = vmul.f32 %v207_v13, %v993_v9  ;;  %v1002_v19 = vadd.f32 %v643_v16, %v988_v0  ;;  %v145_v20 = vpop.f32.mrb[5].mxu0  ;;  %v253_v21 = vadd.f32 %v237_v14, %v131_v2 }
 0x101   :  { %v222_v22 = vmul.f32 %v206_v15, %v996_v11  ;;  %v1006_v23 = vadd.f32 %v988_v0, %v145_v20  ;;  %v252_v24 = vadd.f32 %v236_v17, %v126_v4 }
 0x102   :  { %v209_v25 = vmul.f32 0.044715, %v1002_v19  ;;  %v269_v26 = vmul.f32 0.7978846, %v253_v21  ;;  %v239_v27 = vmul.f32 %v223_v18, %v993_v9 }
 0x103   :  { %v208_v28 = vmul.f32 0.044715, %v1006_v23  ;;  %v646_v29 = vpop.f32.mrb[6].mxu0  ;;  %v268_v30 = vmul.f32 0.7978846, %v252_v24  ;;  %v238_v31 = vmul.f32 %v222_v22, %v996_v11  ;;  %v286_v24 = vmul.f32 0.5, %v996_v11 }
 0x104   :  { %v225_v32 = vmul.f32 %v209_v25, %v1002_v19  ;;  %v1014_v33 = vadd.f32 %v646_v29, %v988_v0  ;;  %v155_v34 = vpop.f32.mrb[7].mxu0  ;;  %779 = vtanh.f32 %v269_v26  ;;  %v255_v35 = vadd.f32 %v239_v27, %v993_v9 }
 0x105   :  { %v224_v36 = vmul.f32 %v208_v28, %v1006_v23  ;;  %v1019_v37 = vadd.f32 %v988_v0, %v155_v34  ;;  %781 = vtanh.f32 %v268_v30  ;;  %v254_v38 = vadd.f32 %v238_v31, %v996_v11 }
 0x106   :  { %v211_v39 = vmul.f32 0.044715, %v1014_v33  ;;  %v271_v40 = vmul.f32 0.7978846, %v255_v35  ;;  %v241_v41 = vmul.f32 %v225_v32, %v1002_v19 }
 0x107   :  { %v210_v42 = vmul.f32 0.044715, %v1019_v37  ;;  %v649_v43 = vpop.f32.mrb[8].mxu0  ;;  %v270_v44 = vmul.f32 0.7978846, %v254_v38  ;;  %v240_v45 = vmul.f32 %v224_v36, %v1006_v23 }
 0x108   :  { %v227_v46 = vmul.f32 %v211_v39, %v1014_v33  ;;  %v1028_v47 = vadd.f32 %v649_v43, %v988_v0  ;;  %v165_v48 = vpop.f32.mrb[9].mxu0  ;;  %783 = vtanh.f32 %v271_v40  ;;  %v257_v49 = vadd.f32 %v241_v41, %v1002_v19 }
 0x109   :  { %v226_v50 = vmul.f32 %v210_v42, %v1019_v37  ;;  %v1033_v51 = vadd.f32 %v988_v0, %v165_v48  ;;  %785 = vtanh.f32 %v270_v44  ;;  %v256_v52 = vadd.f32 %v240_v45, %v1006_v23 }
 0x10a   :  { %v213_v53 = vmul.f32 0.044715, %v1028_v47  ;;  %v273_v55 = vmul.f32 0.7978846, %v257_v49  ;;  %v243_v56 = vmul.f32 %v227_v46, %v1014_v33 }
 0x10b   :  { %v212_v57 = vmul.f32 0.044715, %v1033_v51  ;;  %v652_v58 = vpop.f32.mrb[10].mxu0  ;;  %v272_v60 = vmul.f32 0.7978846, %v256_v52  ;;  %v242_v61 = vmul.f32 %v226_v50, %v1019_v37 }
 0x10c   :  { %v229_v62 = vmul.f32 %v213_v53, %v1028_v47  ;;  %v1042_v63 = vadd.f32 %v652_v58, %v988_v0  ;;  %v175_v1 = vpop.f32.mrb[11].mxu0  ;;  %787 = vtanh.f32 %v273_v55  ;;  %v259_v3 = vadd.f32 %v243_v56, %v1014_v33 }
 0x10d   :  { %v228_v2 = vmul.f32 %v212_v57, %v1033_v51  ;;  %v1047_v5 = vadd.f32 %v988_v0, %v175_v1  ;;  %789 = vtanh.f32 %v272_v60  ;;  %v258_v4 = vadd.f32 %v242_v61, %v1019_v37 }
 0x10e   :  { %v780_v6 = vpop.eup %779  ;;  %v215_v7 = vmul.f32 0.044715, %v1042_v63  ;;  %v275_v10 = vmul.f32 0.7978846, %v259_v3  ;;  %v245_v12 = vmul.f32 %v229_v62, %v1028_v47  ;;  %v289_v1 = vmul.f32 0.5, %v1002_v19 }
 0x10f   :  { %v782_v13 = vpop.eup %781  ;;  %v214_v14 = vmul.f32 0.044715, %v1047_v5  ;;  %v655_v15 = vpop.f32.mrb[12].mxu0  ;;  %v317_v16 = vadd.f32 1.0, %v780_v6  ;;  %v274_v17 = vmul.f32 0.7978846, %v258_v4  ;;  %v244_v18 = vmul.f32 %v228_v2, %v1033_v51 }
 0x110   :  { %v1056_v20 = vadd.f32 %v655_v15, %v988_v0  ;;  %v185_v21 = vpop.f32.mrb[13].mxu0  ;;  %v316_v22 = vadd.f32 1.0, %v782_v13  ;;  %791 = vtanh.f32 %v275_v10  ;;  %v231_v9 = vmul.f32 %v215_v7, %v1042_v63 }
 0x111   :  { %v230_v25 = vmul.f32 %v214_v14, %v1047_v5  ;;  %v1062_v26 = vadd.f32 %v988_v0, %v185_v21  ;;  %793 = vtanh.f32 %v274_v17  ;;  %v260_v30 = vadd.f32 %v244_v18, %v1033_v51 }
 0x112   :  { %v784_v27 = vpop.eup %783  ;;  %v217_v28 = vmul.f32 0.044715, %v1056_v20  ;;  %v332_v29 = vmul.f32 %v316_v22, %v284_v59  ;;  %v261_v31 = vadd.f32 %v245_v12, %v1028_v47  ;;  %v333_v35 = vmul.f32 %v317_v16, %v285_v54 }
 0x113   :  { %v786_v32 = vpop.eup %785  ;;  %v216_v11 = vmul.f32 0.044715, %v1062_v26  ;;  %v658_v34 = vpop.f32.mrb[14].mxu0  ;;  %v319_v36 = vadd.f32 1.0, %v784_v27  ;;  %v246_v38 = vmul.f32 %v230_v25, %v1047_v5  ;;  %v276_v43 = vmul.f32 0.7978846, %v260_v30 }
 0x114   :  { %v233_v39 = vmul.f32 %v217_v28, %v1056_v20  ;;  %v1071_v40 = vadd.f32 %v658_v34, %v988_v0  ;;  %v195_v41 = vpop.f32.mrb[15].mxu0  ;;  %691 = vmatprep.mubr.f32.mxu1 %v332_v29  ;;  %v318_v42 = vadd.f32 1.0, %v786_v32  ;;  %v277_v48 = vmul.f32 0.7978846, %v261_v31 }
 0x115   :  { %v232_v44 = vmul.f32 %v216_v11, %v1062_v26  ;;  %v1075_v45 = vadd.f32 %v988_v0, %v195_v41  ;;  %692 = vmatmul.mubr.f32.vlgmr.msra.gmra.mrb[0].mxu1 %v333_v35  ;;  %v335_v46 = vmul.f32 %v319_v36, %v287_v8  ;;  %795 = vtanh.f32 %v276_v43 }
 0x116   :  { %v788_v49 = vpop.eup %787  ;;  %v219_v50 = vmul.f32 0.044715, %v1071_v40  ;;  %v334_v52 = vmul.f32 %v318_v42, %v286_v24  ;;  %v262_v53 = vadd.f32 %v246_v38, %v1047_v5  ;;  %797 = vtanh.f32 %v277_v48 }
 0x117   :  { %v790_v54 = vpop.eup %789  ;;  %v218_v55 = vmul.f32 0.044715, %v1075_v45  ;;  %v321_v56 = vadd.f32 1.0, %v788_v49  ;;  %v247_v57 = vmul.f32 %v231_v9, %v1042_v63  ;;  %v288_v0 = vmul.f32 0.5, %v1006_v23 }
 0x118   :  { %694 = vmatprep.mubr.f32.mxu1 %v334_v52  ;;  %v320_v58 = vadd.f32 1.0, %v790_v54  ;;  %v278_v59 = vmul.f32 0.7978846, %v262_v53  ;;  %v248_v60 = vmul.f32 %v232_v44, %v1062_v26  ;;  %v235_v61 = vmul.f32 %v219_v50, %v1071_v40 }
 0x119   :  { %v234_v62 = vmul.f32 %v218_v55, %v1075_v45  ;;  %695 = vmatmul.mubr.f32.gmra.mrb[2].mxu1 %v335_v46  ;;  %v263_v3 = vadd.f32 %v247_v57, %v1042_v63  ;;  %v249_v23 = vmul.f32 %v233_v39, %v1056_v20  ;;  %v337_v8 = vmul.f32 %v321_v56, %v289_v1 }
 0x11a   :  { %v792_v2 = vpop.eup %791  ;;  %v336_v4 = vmul.f32 %v320_v58, %v288_v0  ;;  %799 = vtanh.f32 %v278_v59  ;;  %v264_v6 = vadd.f32 %v248_v60, %v1062_v26  ;;  %v290_v14 = vmul.f32 0.5, %v1019_v37  ;;  %v538_v58 = vld [vmem:[%s1175_s4] ss:$0 sm:$0xff] }
 0x11b   :  { %v794_v7 = vpop.eup %793  ;;  %v323_v10 = vadd.f32 1.0, %v792_v2  ;;  %v279_v12 = vmul.f32 0.7978846, %v263_v3  ;;  %v250_v13 = vmul.f32 %v234_v62, %v1075_v45  ;;  %v265_v16 = vadd.f32 %v249_v23, %v1056_v20 }
 0x11c   :  { %697 = vmatprep.mubr.f32.mxu1 %v336_v4  ;;  %v322_v15 = vadd.f32 1.0, %v794_v7  ;;  %v280_v19 = vmul.f32 0.7978846, %v264_v6  ;;  %v291_v17 = vmul.f32 0.5, %v1014_v33  ;;  %v251_v21 = vmul.f32 %v235_v61, %v1071_v40 }
 0x11d   :  { %698 = vmatmul.mubr.f32.gmra.mrb[4].mxu1 %v337_v8  ;;  %801 = vtanh.f32 %v279_v12  ;;  %v266_v18 = vadd.f32 %v250_v13, %v1075_v45  ;;  %v281_v24 = vmul.f32 0.7978846, %v265_v16  ;;  %v292_v29 = vmul.f32 0.5, %v1033_v51 }
 0x11e   :  { %v338_v22 = vmul.f32 %v322_v15, %v290_v14  ;;  %803 = vtanh.f32 %v280_v19  ;;  %v339_v9 = vmul.f32 %v323_v10, %v291_v17  ;;  %v267_v27 = vadd.f32 %v251_v21, %v1071_v40 }
 0x11f   :  { %v282_v25 = vmul.f32 0.7978846, %v266_v18  ;;  %v796_v37 = vpop.eup %795  ;;  %805 = vtanh.f32 %v281_v24  ;;  %v293_v31 = vmul.f32 0.5, %v1028_v47  ;;  %v294_v36 = vmul.f32 0.5, %v1047_v5 }
 0x120   :  { %700 = vmatprep.mubr.f32.mxu1 %v338_v22  ;;  %v798_v28 = vpop.eup %797  ;;  %v324_v33 = vadd.f32 1.0, %v796_v37  ;;  %v283_v30 = vmul.f32 0.7978846, %v267_v27  ;;  %v295_v51 = vmul.f32 0.5, %v1042_v63  ;;  %v296_v44 = vmul.f32 0.5, %v1062_v26 }
 0x121   :  { %701 = vmatmul.mubr.f32.gmra.mrb[6].mxu1 %v339_v9  ;;  %807 = vtanh.f32 %v282_v25  ;;  %v325_v32 = vadd.f32 1.0, %v798_v28  ;;  %v297_v5 = vmul.f32 0.5, %v1056_v20  ;;  %v298_v53 = vmul.f32 0.5, %v1075_v45 }
 0x122   :  { %v340_v11 = vmul.f32 %v324_v33, %v292_v29  ;;  %809 = vtanh.f32 %v283_v30  ;;  %v299_v26 = vmul.f32 0.5, %v1071_v40 }
 0x123   :  { %v341_v35 = vmul.f32 %v325_v32, %v293_v31 }
 0x124   :  { %v800_v34 = vpop.eup %799  ;;  %703 = vmatprep.mubr.f32.mxu1 %v340_v11 }
 0x125   :  { %v326_v38 = vadd.f32 1.0, %v800_v34  ;;  %704 = vmatmul.mubr.f32.gmra.mrb[8].mxu1 %v341_v35 }
 0x127   :  { %v802_v39 = vpop.eup %801  ;;  %v342_v41 = vmul.f32 %v326_v38, %v294_v36 }
 0x128   :  { %v804_v42 = vpop.eup %803  ;;  %v327_v43 = vadd.f32 1.0, %v802_v39 }
 0x129   :  { %706 = vmatprep.mubr.f32.mxu1 %v342_v41  ;;  %v328_v47 = vadd.f32 1.0, %v804_v42  ;;  %v806_v46 = vpop.eup %805 }
 0x12a   :  { %v343_v48 = vmul.f32 %v327_v43, %v295_v51  ;;  %v329_v52 = vadd.f32 1.0, %v806_v46 }
 0x12b   :  { %v808_v49 = vpop.eup %807  ;;  %v344_v50 = vmul.f32 %v328_v47, %v296_v44 }
 0x12c   :  { %707 = vmatmul.mubr.f32.gmra.mrb[10].mxu1 %v343_v48  ;;  %v330_v54 = vadd.f32 1.0, %v808_v49  ;;  %v810_v55 = vpop.eup %809  ;;  %v345_v56 = vmul.f32 %v329_v52, %v297_v5 }
 0x12d   :  { %709 = vmatprep.mubr.f32.mxu1 %v344_v50  ;;  %v331_v57 = vadd.f32 1.0, %v810_v55 }
 0x12e   :  { %v346_v63 = vmul.f32 %v330_v54, %v298_v53 }
 0x12f   :  { %v347_v0 = vmul.f32 %v331_v57, %v299_v26 }
 0x130   :  { %710 = vmatmul.mubr.f32.gmra.mrb[12].mxu1 %v345_v56 }
 0x131   :  { %712 = vmatprep.mubr.f32.mxu1 %v346_v63 }
 0x134   :  { %713 = vmatmul.mubr.f32.gmra.mrb[14].mxu1 %v347_v0 }
 0x1e8   :  { %v693_v59 = vpop.f32.mrb[0].mxu1 }
 0x1e9   :  { %v443_v20 = vadd.f32 %v693_v59, %v538_v58  ;;  %v437_v45 = vpop.f32.mrb[1].mxu1 }
 0x1ea   :  { %v438_v60 = vadd.f32 %v538_v58, %v437_v45 }
 0x1eb   :  { %518 = vst.msk [vmem:[%s1176_s5 + $0x8] sm:$0xff] %vm516_vm0, %v443_v20 }
 0x1ec   :  { %517 = vst.msk [vmem:[%s1176_s5] sm:$0xff] %vm516_vm0, %v438_v60  ;;  %v696_v40 = vpop.f32.mrb[2].mxu1 }
 0x1ed   :  { %v453_v61 = vadd.f32 %v696_v40, %v538_v58  ;;  %v447_v62 = vpop.f32.mrb[3].mxu1 }
 0x1ee   :  { %v448_v1 = vadd.f32 %v538_v58, %v447_v62 }
 0x1ef   :  { %520 = vst.msk [vmem:[%s1176_s5 + $0x18] sm:$0xff] %vm516_vm0, %v453_v61 }
 0x1f0   :  { %519 = vst.msk [vmem:[%s1176_s5 + $0x10] sm:$0xff] %vm516_vm0, %v448_v1  ;;  %v699_v3 = vpop.f32.mrb[4].mxu1 }
 0x1f1   :  { %v463_v2 = vadd.f32 %v699_v3, %v538_v58  ;;  %v457_v4 = vpop.f32.mrb[5].mxu1 }
 0x1f2   :  { %v458_v6 = vadd.f32 %v538_v58, %v457_v4 }
 0x1f3   :  { %522 = vst.msk [vmem:[%s1176_s5 + $0x28] sm:$0xff] %vm516_vm0, %v463_v2 }
 0x1f4   :  { %521 = vst.msk [vmem:[%s1176_s5 + $0x20] sm:$0xff] %vm516_vm0, %v458_v6  ;;  %v702_v23 = vpop.f32.mrb[6].mxu1 }
 0x1f5   :  { %v473_v7 = vadd.f32 %v702_v23, %v538_v58  ;;  %v467_v8 = vpop.f32.mrb[7].mxu1 }
 0x1f6   :  { %v468_v10 = vadd.f32 %v538_v58, %v467_v8 }
 0x1f7   :  { %524 = vst.msk [vmem:[%s1176_s5 + $0x38] sm:$0xff] %vm516_vm0, %v473_v7 }
 0x1f8   :  { %523 = vst.msk [vmem:[%s1176_s5 + $0x30] sm:$0xff] %vm516_vm0, %v468_v10  ;;  %v705_v12 = vpop.f32.mrb[8].mxu1 }
 0x1f9   :  { %v483_v13 = vadd.f32 %v705_v12, %v538_v58  ;;  %v477_v14 = vpop.f32.mrb[9].mxu1 }
 0x1fa   :  { %v478_v15 = vadd.f32 %v538_v58, %v477_v14 }
 0x1fb   :  { %526 = vst.msk [vmem:[%s1176_s5 + $0x48] sm:$0xff] %vm516_vm0, %v483_v13 }
 0x1fc   :  { %525 = vst.msk [vmem:[%s1176_s5 + $0x40] sm:$0xff] %vm516_vm0, %v478_v15 }
 0x1ff   :  { %v708_v19 = vpop.f32.mrb[10].mxu1 }
 0x200   :  { %v493_v16 = vadd.f32 %v708_v19, %v538_v58  ;;  %v487_v17 = vpop.f32.mrb[11].mxu1 }
 0x201   :  { %v488_v18 = vadd.f32 %v538_v58, %v487_v17 }
 0x202   :  { %528 = vst.msk [vmem:[%s1176_s5 + $0x58] sm:$0xff] %vm516_vm0, %v493_v16 }
 0x203   :  { %527 = vst.msk [vmem:[%s1176_s5 + $0x50] sm:$0xff] %vm516_vm0, %v488_v18  ;;  %v711_v21 = vpop.f32.mrb[12].mxu1 }
 0x204   :  { %v503_v22 = vadd.f32 %v711_v21, %v538_v58  ;;  %v497_v24 = vpop.f32.mrb[13].mxu1 }
 0x205   :  { %v498_v9 = vadd.f32 %v538_v58, %v497_v24 }
 0x206   :  { %530 = vst.msk [vmem:[%s1176_s5 + $0x68] sm:$0xff] %vm516_vm0, %v503_v22 }
 0x207   :  { %529 = vst.msk [vmem:[%s1176_s5 + $0x60] sm:$0xff] %vm516_vm0, %v498_v9  ;;  %v714_v25 = vpop.f32.mrb[14].mxu1 }
 0x208   :  { %v513_v27 = vadd.f32 %v714_v25, %v538_v58  ;;  %v507_v37 = vpop.f32.mrb[15].mxu1 }
 0x209   :  { %v508_v28 = vadd.f32 %v538_v58, %v507_v37 }
 0x20a   :  { %532 = vst.msk [vmem:[%s1176_s5 + $0x78] sm:$0xff] %vm516_vm0, %v513_v27 }
 0x20b   :  { %531 = vst.msk [vmem:[%s1176_s5 + $0x70] sm:$0xff] %vm516_vm0, %v508_v28 }

// kernel: mlp_pallas.1
= control target key start
LH: loop header
LB: loop body
LE: loop exit
PB: predicated region body
PF: predicated region fallthrough
CT: control target
= control target key end

     0   :  { %vm516_vm0 = vcmask 261120   ;;  %s1171_s1 = inlined_call_operand.vmem [shape: f32[128,128], index: 1, kind: input, shape index: {}]   ;;  %s1172_s0 = inlined_call_operand.vmem [shape: f32[128,128], index: 0, kind: input, shape index: {}]   ;;  %s1173_s3 = inlined_call_operand.vmem [shape: f32[128,32], index: 3, kind: input, shape index: {}]   ;;  %s1174_s2 = inlined_call_operand.vmem [shape: f32[1,128], index: 2, kind: input, shape index: {}]   ;;  %s1175_s4 = inlined_call_operand.vmem [shape: f32[1,32], index: 4, kind: input, shape index: {}]   ;;  %s1176_s5 = inlined_call_operand.vmem [shape: f32[128,32], index: 5, kind: output, shape index: {}]  }
   0x1   :  { %v36_v0 = vld [vmem:[%s1171_s1] sm:$0xff]  ;;  %v37_v1 = vld [vmem:[%s1171_s1 + $0x8] sm:$0xff]  ;;  %v38_v2 = vld [vmem:[%s1171_s1 + $0x10] sm:$0xff] }
   0x2   :  { %v715_v3 = vpack.c.bf16 %v37_v1, %v36_v0  ;;  %v39_v4 = vld [vmem:[%s1171_s1 + $0x18] sm:$0xff]  ;;  %v40_v6 = vld [vmem:[%s1171_s1 + $0x20] sm:$0xff]  ;;  %v41_v7 = vld [vmem:[%s1171_s1 + $0x28] sm:$0xff] }
   0x3   :  { %v719_v5 = vpack.c.bf16 %v39_v4, %v38_v2  ;;  %v723_v8 = vpack.c.bf16 %v41_v7, %v40_v6  ;;  %v20_v9 = vld [vmem:[%s1172_s0] sm:$0xff]  ;;  %v42_v10 = vld [vmem:[%s1171_s1 + $0x30] sm:$0xff]  ;;  %v43_v11 = vld [vmem:[%s1171_s1 + $0x38] sm:$0xff] }
   0x4   :  { %716 = vmatprep.subr.bf16.mxu0 %v715_v3  ;;  %635 = vmatprep.mubr.f32.mxu0 %v20_v9  ;;  %v727_v12 = vpack.c.bf16 %v43_v11, %v42_v10  ;;  %v44_v13 = vld [vmem:[%s1171_s1 + $0x40] sm:$0xff]  ;;  %v45_v14 = vld [vmem:[%s1171_s1 + $0x48] sm:$0xff]  ;;  %v46_v19 = vld [vmem:[%s1171_s1 + $0x50] sm:$0xff] }
   0x5   :  { %718 = vmatpush3.bf16.msra.mxu0 %v715_v3  ;;  %v348_v15 = vld [vmem:[%s1173_s3] sm:$0xff]  ;;  %v349_v16 = vld [vmem:[%s1173_s3 + $0x8] sm:$0xff]  ;;  %v731_v18 = vpack.c.bf16 %v45_v14, %v44_v13  ;;  %v47_v20 = vld [vmem:[%s1171_s1 + $0x58] sm:$0xff] }
   0x6   :  { %720 = vmatprep.subr.bf16.mxu0 %v719_v5  ;;  %v747_v17 = vpack.c.bf16 %v349_v16, %v348_v15  ;;  %v735_v21 = vpack.c.bf16 %v47_v20, %v46_v19  ;;  %v48_v22 = vld [vmem:[%s1171_s1 + $0x60] sm:$0xff]  ;;  %v49_v23 = vld [vmem:[%s1171_s1 + $0x68] sm:$0xff]  ;;  %v50_v25 = vld [vmem:[%s1171_s1 + $0x70] sm:$0xff] }
   0x7   :  { %v739_v24 = vpack.c.bf16 %v49_v23, %v48_v22  ;;  %v51_v26 = vld [vmem:[%s1171_s1 + $0x78] sm:$0xff]  ;;  %v21_v28 = vld [vmem:[%s1172_s0 + $0x8] sm:$0xff]  ;;  %v22_v29 = vld [vmem:[%s1172_s0 + $0x10] sm:$0xff] }
   0x8   :  { %748 = vmatprep.subr.bf16.mxu1 %v747_v17  ;;  %v743_v27 = vpack.c.bf16 %v51_v26, %v50_v25  ;;  %v23_v30 = vld [vmem:[%s1172_s0 + $0x18] sm:$0xff]  ;;  %v24_v31 = vld [vmem:[%s1172_s0 + $0x20] sm:$0xff]  ;;  %v25_v32 = vld [vmem:[%s1172_s0 + $0x28] sm:$0xff] }
   0x9   :  { %722 = vmatpush3.bf16.msra.mxu0 %v719_v5  ;;  %750 = vmatpush3.bf16.msra.mxu1 %v747_v17  ;;  %v26_v33 = vld [vmem:[%s1172_s0 + $0x30] sm:$0xff]  ;;  %v27_v34 = vld [vmem:[%s1172_s0 + $0x38] sm:$0xff]  ;;  %v28_v35 = vld [vmem:[%s1172_s0 + $0x40] sm:$0xff] }
   0xa   :  { %724 = vmatprep.subr.bf16.mxu0 %v723_v8  ;;  %v29_v36 = vld [vmem:[%s1172_s0 + $0x48] sm:$0xff]  ;;  %v30_v37 = vld [vmem:[%s1172_s0 + $0x50] sm:$0xff]  ;;  %v31_v38 = vld [vmem:[%s1172_s0 + $0x58] sm:$0xff] }
   0xb   :  { %v32_v39 = vld [vmem:[%s1172_s0 + $0x60] sm:$0xff]  ;;  %v33_v40 = vld [vmem:[%s1172_s0 + $0x68] sm:$0xff]  ;;  %v34_v41 = vld [vmem:[%s1172_s0 + $0x70] sm:$0xff] }
   0xc   :  { %v35_v42 = vld [vmem:[%s1172_s0 + $0x78] sm:$0xff]  ;;  %v350_v43 = vld [vmem:[%s1173_s3 + $0x10] sm:$0xff]  ;;  %v352_v46 = vld [vmem:[%s1173_s3 + $0x20] sm:$0xff] }
   0xd   :  { %726 = vmatpush3.bf16.msra.mxu0 %v723_v8  ;;  %v351_v44 = vld [vmem:[%s1173_s3 + $0x18] sm:$0xff]  ;;  %v353_v47 = vld [vmem:[%s1173_s3 + $0x28] sm:$0xff]  ;;  %v354_v49 = vld [vmem:[%s1173_s3 + $0x30] sm:$0xff] }
   0xe   :  { %728 = vmatprep.subr.bf16.mxu0 %v727_v12  ;;  %v751_v45 = vpack.c.bf16 %v351_v44, %v350_v43  ;;  %v755_v48 = vpack.c.bf16 %v353_v47, %v352_v46  ;;  %v355_v50 = vld [vmem:[%s1173_s3 + $0x38] sm:$0xff]  ;;  %v356_v52 = vld [vmem:[%s1173_s3 + $0x40] sm:$0xff]  ;;  %v357_v53 = vld [vmem:[%s1173_s3 + $0x48] sm:$0xff] }
   0xf   :  { %v759_v51 = vpack.c.bf16 %v355_v50, %v354_v49  ;;  %v763_v54 = vpack.c.bf16 %v357_v53, %v356_v52  ;;  %v358_v55 = vld [vmem:[%s1173_s3 + $0x50] sm:$0xff]  ;;  %v359_v56 = vld [vmem:[%s1173_s3 + $0x58] sm:$0xff]  ;;  %v360_v58 = vld [vmem:[%s1173_s3 + $0x60] sm:$0xff] }
  0x10   :  { %752 = vmatprep.subr.bf16.mxu1 %v751_v45  ;;  %v767_v57 = vpack.c.bf16 %v359_v56, %v358_v55  ;;  %v361_v59 = vld [vmem:[%s1173_s3 + $0x68] sm:$0xff]  ;;  %v362_v61 = vld [vmem:[%s1173_s3 + $0x70] sm:$0xff]  ;;  %v363_v62 = vld [vmem:[%s1173_s3 + $0x78] sm:$0xff] }
  0x11   :  { %730 = vmatpush3.bf16.msra.mxu0 %v727_v12  ;;  %754 = vmatpush3.bf16.msra.mxu1 %v751_v45  ;;  %v771_v60 = vpack.c.bf16 %v361_v59, %v360_v58  ;;  %v775_v63 = vpack.c.bf16 %v363_v62, %v362_v61  ;;  %v988_v0 = vld [vmem:[%s1174_s2] ss:$0 sm:$0xff] }
  0x12   :  { %732 = vmatprep.subr.bf16.mxu0 %v731_v18  ;;  %756 = vmatprep.subr.bf16.mxu1 %v755_v48 }
  0x15   :  { %734 = vmatpush3.bf16.msra.mxu0 %v731_v18  ;;  %758 = vmatpush3.bf16.msra.mxu1 %v755_v48 }
  0x16   :  { %736 = vmatprep.subr.bf16.mxu0 %v735_v21  ;;  %760 = vmatprep.subr.bf16.mxu1 %v759_v51 }
  0x19   :  { %738 = vmatpush3.bf16.msra.mxu0 %v735_v21  ;;  %762 = vmatpush3.bf16.msra.mxu1 %v759_v51 }
  0x1a   :  { %740 = vmatprep.subr.bf16.mxu0 %v739_v24  ;;  %764 = vmatprep.subr.bf16.mxu1 %v763_v54 }
  0x1d   :  { %742 = vmatpush3.bf16.msra.mxu0 %v739_v24  ;;  %766 = vmatpush3.bf16.msra.mxu1 %v763_v54 }
  0x1e   :  { %744 = vmatprep.subr.bf16.mxu0 %v743_v27  ;;  %768 = vmatprep.subr.bf16.mxu1 %v767_v57 }
  0x21   :  { %746 = vmatpush3.bf16.msra.mxu0 %v743_v27  ;;  %770 = vmatpush3.bf16.msra.mxu1 %v767_v57 }
  0x22   :  { %772 = vmatprep.subr.bf16.mxu1 %v771_v60 }
  0x24   :  { %636 = vmatmul.mubr.f32.vlgmr.msra.gmra.mrb[0].mxu0 %v21_v28 }
  0x25   :  { %638 = vmatprep.mubr.f32.mxu0 %v22_v29  ;;  %774 = vmatpush3.bf16.msra.mxu1 %v771_v60 }
  0x26   :  { %776 = vmatprep.subr.bf16.mxu1 %v775_v63 }
  0x28   :  { %639 = vmatmul.mubr.f32.gmra.mrb[2].mxu0 %v23_v30 }
  0x29   :  { %641 = vmatprep.mubr.f32.mxu0 %v24_v31  ;;  %778 = vmatpush3.bf16.msra.mxu1 %v775_v63 }
  0x2c   :  { %642 = vmatmul.mubr.f32.gmra.mrb[4].mxu0 %v25_v32 }
  0x2d   :  { %644 = vmatprep.mubr.f32.mxu0 %v26_v33 }
  0x30   :  { %645 = vmatmul.mubr.f32.gmra.mrb[6].mxu0 %v27_v34 }
  0x31   :  { %647 = vmatprep.mubr.f32.mxu0 %v28_v35 }
  0x34   :  { %648 = vmatmul.mubr.f32.gmra.mrb[8].mxu0 %v29_v36 }
  0x35   :  { %650 = vmatprep.mubr.f32.mxu0 %v30_v37 }
  0x38   :  { %651 = vmatmul.mubr.f32.gmra.mrb[10].mxu0 %v31_v38 }
  0x39   :  { %653 = vmatprep.mubr.f32.mxu0 %v32_v39 }
  0x3c   :  { %654 = vmatmul.mubr.f32.gmra.mrb[12].mxu0 %v33_v40 }
  0x3d   :  { %656 = vmatprep.mubr.f32.mxu0 %v34_v41 }
  0x40   :  { %657 = vmatmul.mubr.f32.gmra.mrb[14].mxu0 %v35_v42 }
  0xf7   :  { %v637_v1 = vpop.f32.mrb[0].mxu0 }
  0xf8   :  { %v131_v2 = vadd.f32 %v637_v1, %v988_v0  ;;  %v125_v3 = vpop.f32.mrb[1].mxu0 }
  0xf9   :  { %v126_v4 = vadd.f32 %v988_v0, %v125_v3 }
  0xfa   :  { %v205_v5 = vmul.f32 0.044715, %v131_v2  ;;  %v285_v54 = vmul.f32 0.5, %v131_v2 }
  0xfb   :  { %v640_v6 = vpop.f32.mrb[2].mxu0  ;;  %v204_v7 = vmul.f32 0.044715, %v126_v4  ;;  %v284_v59 = vmul.f32 0.5, %v126_v4 }
  0xfc   :  { %v221_v8 = vmul.f32 %v205_v5, %v131_v2  ;;  %v993_v9 = vadd.f32 %v640_v6, %v988_v0  ;;  %v135_v10 = vpop.f32.mrb[3].mxu0 }
  0xfd   :  { %v996_v11 = vadd.f32 %v988_v0, %v135_v10  ;;  %v220_v12 = vmul.f32 %v204_v7, %v126_v4 }
  0xfe   :  { %v207_v13 = vmul.f32 0.044715, %v993_v9  ;;  %v237_v14 = vmul.f32 %v221_v8, %v131_v2  ;;  %v287_v8 = vmul.f32 0.5, %v993_v9 }
  0xff   :  { %v206_v15 = vmul.f32 0.044715, %v996_v11  ;;  %v643_v16 = vpop.f32.mrb[4].mxu0  ;;  %v236_v17 = vmul.f32 %v220_v12, %v126_v4 }
 0x100   :  { %v223_v18 = vmul.f32 %v207_v13, %v993_v9  ;;  %v1002_v19 = vadd.f32 %v643_v16, %v988_v0  ;;  %v145_v20 = vpop.f32.mrb[5].mxu0  ;;  %v253_v21 = vadd.f32 %v237_v14, %v131_v2 }
 0x101   :  { %v222_v22 = vmul.f32 %v206_v15, %v996_v11  ;;  %v1006_v23 = vadd.f32 %v988_v0, %v145_v20  ;;  %v252_v24 = vadd.f32 %v236_v17, %v126_v4 }
 0x102   :  { %v209_v25 = vmul.f32 0.044715, %v1002_v19  ;;  %v269_v26 = vmul.f32 0.7978846, %v253_v21  ;;  %v239_v27 = vmul.f32 %v223_v18, %v993_v9 }
 0x103   :  { %v208_v28 = vmul.f32 0.044715, %v1006_v23  ;;  %v646_v29 = vpop.f32.mrb[6].mxu0  ;;  %v268_v30 = vmul.f32 0.7978846, %v252_v24  ;;  %v238_v31 = vmul.f32 %v222_v22, %v996_v11  ;;  %v286_v24 = vmul.f32 0.5, %v996_v11 }
 0x104   :  { %v225_v32 = vmul.f32 %v209_v25, %v1002_v19  ;;  %v1014_v33 = vadd.f32 %v646_v29, %v988_v0  ;;  %v155_v34 = vpop.f32.mrb[7].mxu0  ;;  %779 = vtanh.f32 %v269_v26  ;;  %v255_v35 = vadd.f32 %v239_v27, %v993_v9 }
 0x105   :  { %v224_v36 = vmul.f32 %v208_v28, %v1006_v23  ;;  %v1019_v37 = vadd.f32 %v988_v0, %v155_v34  ;;  %781 = vtanh.f32 %v268_v30  ;;  %v254_v38 = vadd.f32 %v238_v31, %v996_v11 }
 0x106   :  { %v211_v39 = vmul.f32 0.044715, %v1014_v33  ;;  %v271_v40 = vmul.f32 0.7978846, %v255_v35  ;;  %v241_v41 = vmul.f32 %v225_v32, %v1002_v19 }
 0x107   :  { %v210_v42 = vmul.f32 0.044715, %v1019_v37  ;;  %v649_v43 = vpop.f32.mrb[8].mxu0  ;;  %v270_v44 = vmul.f32 0.7978846, %v254_v38  ;;  %v240_v45 = vmul.f32 %v224_v36, %v1006_v23 }
 0x108   :  { %v227_v46 = vmul.f32 %v211_v39, %v1014_v33  ;;  %v1028_v47 = vadd.f32 %v649_v43, %v988_v0  ;;  %v165_v48 = vpop.f32.mrb[9].mxu0  ;;  %783 = vtanh.f32 %v271_v40  ;;  %v257_v49 = vadd.f32 %v241_v41, %v1002_v19 }
 0x109   :  { %v226_v50 = vmul.f32 %v210_v42, %v1019_v37  ;;  %v1033_v51 = vadd.f32 %v988_v0, %v165_v48  ;;  %785 = vtanh.f32 %v270_v44  ;;  %v256_v52 = vadd.f32 %v240_v45, %v1006_v23 }
 0x10a   :  { %v213_v53 = vmul.f32 0.044715, %v1028_v47  ;;  %v273_v55 = vmul.f32 0.7978846, %v257_v49  ;;  %v243_v56 = vmul.f32 %v227_v46, %v1014_v33 }
 0x10b   :  { %v212_v57 = vmul.f32 0.044715, %v1033_v51  ;;  %v652_v58 = vpop.f32.mrb[10].mxu0  ;;  %v272_v60 = vmul.f32 0.7978846, %v256_v52  ;;  %v242_v61 = vmul.f32 %v226_v50, %v1019_v37 }
 0x10c   :  { %v229_v62 = vmul.f32 %v213_v53, %v1028_v47  ;;  %v1042_v63 = vadd.f32 %v652_v58, %v988_v0  ;;  %v175_v1 = vpop.f32.mrb[11].mxu0  ;;  %787 = vtanh.f32 %v273_v55  ;;  %v259_v3 = vadd.f32 %v243_v56, %v1014_v33 }
 0x10d   :  { %v228_v2 = vmul.f32 %v212_v57, %v1033_v51  ;;  %v1047_v5 = vadd.f32 %v988_v0, %v175_v1  ;;  %789 = vtanh.f32 %v272_v60  ;;  %v258_v4 = vadd.f32 %v242_v61, %v1019_v37 }
 0x10e   :  { %v780_v6 = vpop.eup %779  ;;  %v215_v7 = vmul.f32 0.044715, %v1042_v63  ;;  %v275_v10 = vmul.f32 0.7978846, %v259_v3  ;;  %v245_v12 = vmul.f32 %v229_v62, %v1028_v47  ;;  %v289_v1 = vmul.f32 0.5, %v1002_v19 }
 0x10f   :  { %v782_v13 = vpop.eup %781  ;;  %v214_v14 = vmul.f32 0.044715, %v1047_v5  ;;  %v655_v15 = vpop.f32.mrb[12].mxu0  ;;  %v317_v16 = vadd.f32 1.0, %v780_v6  ;;  %v274_v17 = vmul.f32 0.7978846, %v258_v4  ;;  %v244_v18 = vmul.f32 %v228_v2, %v1033_v51 }
 0x110   :  { %v1056_v20 = vadd.f32 %v655_v15, %v988_v0  ;;  %v185_v21 = vpop.f32.mrb[13].mxu0  ;;  %v316_v22 = vadd.f32 1.0, %v782_v13  ;;  %791 = vtanh.f32 %v275_v10  ;;  %v231_v9 = vmul.f32 %v215_v7, %v1042_v63 }
 0x111   :  { %v230_v25 = vmul.f32 %v214_v14, %v1047_v5  ;;  %v1062_v26 = vadd.f32 %v988_v0, %v185_v21  ;;  %793 = vtanh.f32 %v274_v17  ;;  %v260_v30 = vadd.f32 %v244_v18, %v1033_v51 }
 0x112   :  { %v784_v27 = vpop.eup %783  ;;  %v217_v28 = vmul.f32 0.044715, %v1056_v20  ;;  %v332_v29 = vmul.f32 %v316_v22, %v284_v59  ;;  %v261_v31 = vadd.f32 %v245_v12, %v1028_v47  ;;  %v333_v35 = vmul.f32 %v317_v16, %v285_v54 }
 0x113   :  { %v786_v32 = vpop.eup %785  ;;  %v216_v11 = vmul.f32 0.044715, %v1062_v26  ;;  %v658_v34 = vpop.f32.mrb[14].mxu0  ;;  %v319_v36 = vadd.f32 1.0, %v784_v27  ;;  %v246_v38 = vmul.f32 %v230_v25, %v1047_v5  ;;  %v276_v43 = vmul.f32 0.7978846, %v260_v30 }
 0x114   :  { %v233_v39 = vmul.f32 %v217_v28, %v1056_v20  ;;  %v1071_v40 = vadd.f32 %v658_v34, %v988_v0  ;;  %v195_v41 = vpop.f32.mrb[15].mxu0  ;;  %691 = vmatprep.mubr.f32.mxu1 %v332_v29  ;;  %v318_v42 = vadd.f32 1.0, %v786_v32  ;;  %v277_v48 = vmul.f32 0.7978846, %v261_v31 }
 0x115   :  { %v232_v44 = vmul.f32 %v216_v11, %v1062_v26  ;;  %v1075_v45 = vadd.f32 %v988_v0, %v195_v41  ;;  %692 = vmatmul.mubr.f32.vlgmr.msra.gmra.mrb[0].mxu1 %v333_v35  ;;  %v335_v46 = vmul.f32 %v319_v36, %v287_v8  ;;  %795 = vtanh.f32 %v276_v43 }
 0x116   :  { %v788_v49 = vpop.eup %787  ;;  %v219_v50 = vmul.f32 0.044715, %v1071_v40  ;;  %v334_v52 = vmul.f32 %v318_v42, %v286_v24  ;;  %v262_v53 = vadd.f32 %v246_v38, %v1047_v5  ;;  %797 = vtanh.f32 %v277_v48 }
 0x117   :  { %v790_v54 = vpop.eup %789  ;;  %v218_v55 = vmul.f32 0.044715, %v1075_v45  ;;  %v321_v56 = vadd.f32 1.0, %v788_v49  ;;  %v247_v57 = vmul.f32 %v231_v9, %v1042_v63  ;;  %v288_v0 = vmul.f32 0.5, %v1006_v23 }
 0x118   :  { %694 = vmatprep.mubr.f32.mxu1 %v334_v52  ;;  %v320_v58 = vadd.f32 1.0, %v790_v54  ;;  %v278_v59 = vmul.f32 0.7978846, %v262_v53  ;;  %v248_v60 = vmul.f32 %v232_v44, %v1062_v26  ;;  %v235_v61 = vmul.f32 %v219_v50, %v1071_v40 }
 0x119   :  { %v234_v62 = vmul.f32 %v218_v55, %v1075_v45  ;;  %695 = vmatmul.mubr.f32.gmra.mrb[2].mxu1 %v335_v46  ;;  %v263_v3 = vadd.f32 %v247_v57, %v1042_v63  ;;  %v249_v23 = vmul.f32 %v233_v39, %v1056_v20  ;;  %v337_v8 = vmul.f32 %v321_v56, %v289_v1 }
 0x11a   :  { %v792_v2 = vpop.eup %791  ;;  %v336_v4 = vmul.f32 %v320_v58, %v288_v0  ;;  %799 = vtanh.f32 %v278_v59  ;;  %v264_v6 = vadd.f32 %v248_v60, %v1062_v26  ;;  %v290_v14 = vmul.f32 0.5, %v1019_v37  ;;  %v538_v58 = vld [vmem:[%s1175_s4] ss:$0 sm:$0xff] }
 0x11b   :  { %v794_v7 = vpop.eup %793  ;;  %v323_v10 = vadd.f32 1.0, %v792_v2  ;;  %v279_v12 = vmul.f32 0.7978846, %v263_v3  ;;  %v250_v13 = vmul.f32 %v234_v62, %v1075_v45  ;;  %v265_v16 = vadd.f32 %v249_v23, %v1056_v20 }
 0x11c   :  { %697 = vmatprep.mubr.f32.mxu1 %v336_v4  ;;  %v322_v15 = vadd.f32 1.0, %v794_v7  ;;  %v280_v19 = vmul.f32 0.7978846, %v264_v6  ;;  %v291_v17 = vmul.f32 0.5, %v1014_v33  ;;  %v251_v21 = vmul.f32 %v235_v61, %v1071_v40 }
 0x11d   :  { %698 = vmatmul.mubr.f32.gmra.mrb[4].mxu1 %v337_v8  ;;  %801 = vtanh.f32 %v279_v12  ;;  %v266_v18 = vadd.f32 %v250_v13, %v1075_v45  ;;  %v281_v24 = vmul.f32 0.7978846, %v265_v16  ;;  %v292_v29 = vmul.f32 0.5, %v1033_v51 }
 0x11e   :  { %v338_v22 = vmul.f32 %v322_v15, %v290_v14  ;;  %803 = vtanh.f32 %v280_v19  ;;  %v339_v9 = vmul.f32 %v323_v10, %v291_v17  ;;  %v267_v27 = vadd.f32 %v251_v21, %v1071_v40 }
 0x11f   :  { %v282_v25 = vmul.f32 0.7978846, %v266_v18  ;;  %v796_v37 = vpop.eup %795  ;;  %805 = vtanh.f32 %v281_v24  ;;  %v293_v31 = vmul.f32 0.5, %v1028_v47  ;;  %v294_v36 = vmul.f32 0.5, %v1047_v5 }
 0x120   :  { %700 = vmatprep.mubr.f32.mxu1 %v338_v22  ;;  %v798_v28 = vpop.eup %797  ;;  %v324_v33 = vadd.f32 1.0, %v796_v37  ;;  %v283_v30 = vmul.f32 0.7978846, %v267_v27  ;;  %v295_v51 = vmul.f32 0.5, %v1042_v63  ;;  %v296_v44 = vmul.f32 0.5, %v1062_v26 }
 0x121   :  { %701 = vmatmul.mubr.f32.gmra.mrb[6].mxu1 %v339_v9  ;;  %807 = vtanh.f32 %v282_v25  ;;  %v325_v32 = vadd.f32 1.0, %v798_v28  ;;  %v297_v5 = vmul.f32 0.5, %v1056_v20  ;;  %v298_v53 = vmul.f32 0.5, %v1075_v45 }
 0x122   :  { %v340_v11 = vmul.f32 %v324_v33, %v292_v29  ;;  %809 = vtanh.f32 %v283_v30  ;;  %v299_v26 = vmul.f32 0.5, %v1071_v40 }
 0x123   :  { %v341_v35 = vmul.f32 %v325_v32, %v293_v31 }
 0x124   :  { %v800_v34 = vpop.eup %799  ;;  %703 = vmatprep.mubr.f32.mxu1 %v340_v11 }
 0x125   :  { %v326_v38 = vadd.f32 1.0, %v800_v34  ;;  %704 = vmatmul.mubr.f32.gmra.mrb[8].mxu1 %v341_v35 }
 0x127   :  { %v802_v39 = vpop.eup %801  ;;  %v342_v41 = vmul.f32 %v326_v38, %v294_v36 }
 0x128   :  { %v804_v42 = vpop.eup %803  ;;  %v327_v43 = vadd.f32 1.0, %v802_v39 }
 0x129   :  { %706 = vmatprep.mubr.f32.mxu1 %v342_v41  ;;  %v328_v47 = vadd.f32 1.0, %v804_v42  ;;  %v806_v46 = vpop.eup %805 }
 0x12a   :  { %v343_v48 = vmul.f32 %v327_v43, %v295_v51  ;;  %v329_v52 = vadd.f32 1.0, %v806_v46 }
 0x12b   :  { %v808_v49 = vpop.eup %807  ;;  %v344_v50 = vmul.f32 %v328_v47, %v296_v44 }
 0x12c   :  { %707 = vmatmul.mubr.f32.gmra.mrb[10].mxu1 %v343_v48  ;;  %v330_v54 = vadd.f32 1.0, %v808_v49  ;;  %v810_v55 = vpop.eup %809  ;;  %v345_v56 = vmul.f32 %v329_v52, %v297_v5 }
 0x12d   :  { %709 = vmatprep.mubr.f32.mxu1 %v344_v50  ;;  %v331_v57 = vadd.f32 1.0, %v810_v55 }
 0x12e   :  { %v346_v63 = vmul.f32 %v330_v54, %v298_v53 }
 0x12f   :  { %v347_v0 = vmul.f32 %v331_v57, %v299_v26 }
 0x130   :  { %710 = vmatmul.mubr.f32.gmra.mrb[12].mxu1 %v345_v56 }
 0x131   :  { %712 = vmatprep.mubr.f32.mxu1 %v346_v63 }
 0x134   :  { %713 = vmatmul.mubr.f32.gmra.mrb[14].mxu1 %v347_v0 }
 0x1e8   :  { %v693_v59 = vpop.f32.mrb[0].mxu1 }
 0x1e9   :  { %v443_v20 = vadd.f32 %v693_v59, %v538_v58  ;;  %v437_v45 = vpop.f32.mrb[1].mxu1 }
 0x1ea   :  { %v438_v60 = vadd.f32 %v538_v58, %v437_v45 }
 0x1eb   :  { %518 = vst.msk [vmem:[%s1176_s5 + $0x8] sm:$0xff] %vm516_vm0, %v443_v20 }
 0x1ec   :  { %517 = vst.msk [vmem:[%s1176_s5] sm:$0xff] %vm516_vm0, %v438_v60  ;;  %v696_v40 = vpop.f32.mrb[2].mxu1 }
 0x1ed   :  { %v453_v61 = vadd.f32 %v696_v40, %v538_v58  ;;  %v447_v62 = vpop.f32.mrb[3].mxu1 }
 0x1ee   :  { %v448_v1 = vadd.f32 %v538_v58, %v447_v62 }
 0x1ef   :  { %520 = vst.msk [vmem:[%s1176_s5 + $0x18] sm:$0xff] %vm516_vm0, %v453_v61 }
 0x1f0   :  { %519 = vst.msk [vmem:[%s1176_s5 + $0x10] sm:$0xff] %vm516_vm0, %v448_v1  ;;  %v699_v3 = vpop.f32.mrb[4].mxu1 }
 0x1f1   :  { %v463_v2 = vadd.f32 %v699_v3, %v538_v58  ;;  %v457_v4 = vpop.f32.mrb[5].mxu1 }
 0x1f2   :  { %v458_v6 = vadd.f32 %v538_v58, %v457_v4 }
 0x1f3   :  { %522 = vst.msk [vmem:[%s1176_s5 + $0x28] sm:$0xff] %vm516_vm0, %v463_v2 }
 0x1f4   :  { %521 = vst.msk [vmem:[%s1176_s5 + $0x20] sm:$0xff] %vm516_vm0, %v458_v6  ;;  %v702_v23 = vpop.f32.mrb[6].mxu1 }
 0x1f5   :  { %v473_v7 = vadd.f32 %v702_v23, %v538_v58  ;;  %v467_v8 = vpop.f32.mrb[7].mxu1 }
 0x1f6   :  { %v468_v10 = vadd.f32 %v538_v58, %v467_v8 }
 0x1f7   :  { %524 = vst.msk [vmem:[%s1176_s5 + $0x38] sm:$0xff] %vm516_vm0, %v473_v7 }
 0x1f8   :  { %523 = vst.msk [vmem:[%s1176_s5 + $0x30] sm:$0xff] %vm516_vm0, %v468_v10  ;;  %v705_v12 = vpop.f32.mrb[8].mxu1 }
 0x1f9   :  { %v483_v13 = vadd.f32 %v705_v12, %v538_v58  ;;  %v477_v14 = vpop.f32.mrb[9].mxu1 }
 0x1fa   :  { %v478_v15 = vadd.f32 %v538_v58, %v477_v14 }
 0x1fb   :  { %526 = vst.msk [vmem:[%s1176_s5 + $0x48] sm:$0xff] %vm516_vm0, %v483_v13 }
 0x1fc   :  { %525 = vst.msk [vmem:[%s1176_s5 + $0x40] sm:$0xff] %vm516_vm0, %v478_v15 }
 0x1ff   :  { %v708_v19 = vpop.f32.mrb[10].mxu1 }
 0x200   :  { %v493_v16 = vadd.f32 %v708_v19, %v538_v58  ;;  %v487_v17 = vpop.f32.mrb[11].mxu1 }
 0x201   :  { %v488_v18 = vadd.f32 %v538_v58, %v487_v17 }
 0x202   :  { %528 = vst.msk [vmem:[%s1176_s5 + $0x58] sm:$0xff] %vm516_vm0, %v493_v16 }
 0x203   :  { %527 = vst.msk [vmem:[%s1176_s5 + $0x50] sm:$0xff] %vm516_vm0, %v488_v18  ;;  %v711_v21 = vpop.f32.mrb[12].mxu1 }
 0x204   :  { %v503_v22 = vadd.f32 %v711_v21, %v538_v58  ;;  %v497_v24 = vpop.f32.mrb[13].mxu1 }
 0x205   :  { %v498_v9 = vadd.f32 %v538_v58, %v497_v24 }
 0x206   :  { %530 = vst.msk [vmem:[%s1176_s5 + $0x68] sm:$0xff] %vm516_vm0, %v503_v22 }
 0x207   :  { %529 = vst.msk [vmem:[%s1176_s5 + $0x60] sm:$0xff] %vm516_vm0, %v498_v9  ;;  %v714_v25 = vpop.f32.mrb[14].mxu1 }
 0x208   :  { %v513_v27 = vadd.f32 %v714_v25, %v538_v58  ;;  %v507_v37 = vpop.f32.mrb[15].mxu1 }
 0x209   :  { %v508_v28 = vadd.f32 %v538_v58, %v507_v37 }
 0x20a   :  { %532 = vst.msk [vmem:[%s1176_s5 + $0x78] sm:$0xff] %vm516_vm0, %v513_v27 }
 0x20b   :  { %531 = vst.msk [vmem:[%s1176_s5 + $0x70] sm:$0xff] %vm516_vm0, %v508_v28 }

</bundles_post_ra>
